<compile_context>
chip_gen: v7x
topology: tpu7x:2x2x1
jax: 0.10.0
libtpu: 0.0.40
codegen_flags: <defaults>
</compile_context>

<pallas_src>
import jax
import jax.numpy as jnp
from jax.experimental import pallas as pl
from jax.experimental.pallas import tpu as pltpu

BN_EPS = 1e-5


def _vmem_capacity_bytes():
    """Generation-aware VMEM capacity (falls back to the smallest, v7x)."""
    try:
        return int(pltpu.get_tpu_info().vmem_capacity_bytes)
    except Exception:
        return 64 << 20


def _conv3x3_row_matrices(w3, W, C, Lp):
    """Fold Conv3x3 (stride 1, padding 1) into 3 block-tridiagonal matrices.

    Lane layout: l = w*C + c.  For each ky (dy = ky-1):
      T_dy[w_in*C+ci, w_out*C+co] = w3[ky, (w_in-w_out)+1, ci, co]  if |w_in-w_out| <= 1
    which folds the dx shift, channel mixing and width-boundary masking into
    the weights.  Returns (3*Lp, Lp) float32 (dy = -1, 0, +1 stacked on rows).
    """
    L = W * C
    w_in = jnp.arange(W)[:, None]
    w_out = jnp.arange(W)[None, :]
    dx = w_in - w_out                                     # (W, W)
    valid = (jnp.abs(dx) <= 1).astype(jnp.float32)
    kx = jnp.clip(dx + 1, 0, 2)
    mats = []
    for ky in range(3):
        blocks = w3[ky][kx]                               # (W, W, C, C)
        blocks = blocks * valid[:, :, None, None]
        t = blocks.transpose(0, 2, 1, 3).reshape(L, L)    # [w_in*C+ci, w_out*C+co]
        mats.append(jnp.pad(t, ((0, Lp - L), (0, Lp - L))))
    return jnp.concatenate(mats, axis=0)                  # (3*Lp, Lp)


def _make_kernel(N, H, W, C, M_rows, Lp):
    inv_count = 1.0 / (N * H * W)

    def kernel(x_ref, p_ref, s_ref, w3_ref, w1_ref, out_ref):
        s_mat = s_ref[...]                                # (Lp, Lp) f32 channel sum+broadcast

        def bn(v, g, b):
            # Training-mode BatchNorm2d: per-channel batch stats over (N,H,W).
            # Per-lane sums -> per-channel sums broadcast back to all lanes of
            # the same channel via s_mat.  Centered two-pass variance, f32.
            lane_sum = jnp.sum(v, axis=0, keepdims=True)                    # (1, Lp)
            mean = jnp.dot(lane_sum, s_mat,
                           preferred_element_type=jnp.float32) * inv_count  # (1, Lp)
            centered = v - mean
            lane_ssq = jnp.sum(centered * centered, axis=0, keepdims=True)
            var = jnp.dot(lane_ssq, s_mat,
                          preferred_element_type=jnp.float32) * inv_count
            return centered * jax.lax.rsqrt(var + BN_EPS) * g + b

        def mm(a, w):                                     # MXU matmul, f32 accumulate
            return jnp.dot(a.astype(w.dtype), w, preferred_element_type=jnp.float32)

        p = p_ref[...]                                    # (8, Lp) packed per-lane params
        g1, be1, b3 = p[0:1, :], p[1:2, :], p[2:3, :]
        g2, be2, bc1 = p[3:4, :], p[4:5, :], p[5:6, :]
        g3, be3 = p[6:7, :], p[7:8, :]

        # ---- BN1 + ReLU ------------------------------------------------------
        h1 = jnp.maximum(bn(x_ref[...], g1, be1), 0.0)

        # ---- Conv3x3, stride 1, padding 1 --------------------------------------
        # Tap-grouped accumulation: one sublane roll + one (M,Lp)x(Lp,Lp) matmul
        # per dy; only one shifted copy is ever live.  Height-boundary masks
        # hoisted out of the loop; width boundaries live inside the weights.
        h_idx = jax.lax.broadcasted_iota(jnp.int32, (M_rows, 1), 0) % H
        row_mask = {-1: (h_idx >= 1).astype(jnp.float32),
                    1: (h_idx < H - 1).astype(jnp.float32)}
        acc = jnp.zeros((M_rows, Lp), jnp.float32)
        for k, dy in enumerate((-1, 0, 1)):
            if dy == 0:
                shifted = h1
            else:
                shifted = pltpu.roll(h1, shift=(-dy) % M_rows, axis=0) * row_mask[dy]
            acc = acc + mm(shifted, w3_ref[k * Lp:(k + 1) * Lp, :])
        y1 = acc + b3

        # ---- BN2 + ReLU --------------------------------------------------------
        h2 = jnp.maximum(bn(y1, g2, be2), 0.0)

        # ---- Conv1x1 ------------------------------------------------------------
        y2 = mm(h2, w1_ref[...]) + bc1

        # ---- BN3 + residual add + ReLU -------------------------------------------
        # Residual re-read from x_ref here so x is not held live across the
        # convs / BNs above.
        out_ref[...] = jnp.maximum(bn(y2, g3, be3) + x_ref[...], 0.0)

    return kernel


def resblock_forward_nhwc(x_nhwc, params, *, matmul_dtype=jnp.float32):
    """resblock forward on channels-last input (preferred: no NCHW round trips).

    Lane layout: rows = N*H, lanes = W*C zero-padded to a multiple of 128.
    All padded weight rows/cols, per-lane params and the stats matrix are
    zero (packed here from unpadded (C,) vectors), so padded lanes never leak
    into BN statistics or the residual.
    """
    N, H, W, C = x_nhwc.shape
    L = W * C
    Lp = max(128, ((L + 127) // 128) * 128)
    M_rows = N * H
    # TODO(synk): for C >= 128 switch to a channel-major (N*H*W, C) layout; the
    # folded conv matrices grow as (W*C)^2 and stop making sense there.
    assert Lp <= 1024, f"W*C = {L} too large for the small-C lane-packing path."

    x_rows = x_nhwc.astype(jnp.float32).reshape(M_rows, L)
    if Lp != L:
        x_rows = jnp.pad(x_rows, ((0, 0), (0, Lp - L)))

    def lane_vec(v):                       # (C,) per-channel -> (1, Lp) per-lane
        t = jnp.tile(v.reshape(-1).astype(jnp.float32), W)
        return jnp.pad(t, (0, Lp - L)).reshape(1, Lp)

    # One packed (8, Lp) param slab: a single small DMA instead of 8 tiny ones.
    bn_pack = jnp.concatenate(
        [lane_vec(params["g1"]), lane_vec(params["be1"]), lane_vec(params["b3"]),
         lane_vec(params["g2"]), lane_vec(params["be2"]), lane_vec(params["bc1"]),
         lane_vec(params["g3"]), lane_vec(params["be3"])], axis=0)

    # Per-channel sum-and-broadcast matrix for BN stats (always f32).
    s_mat = jnp.kron(jnp.ones((W, W), jnp.float32), jnp.eye(C, dtype=jnp.float32))
    s_mat = jnp.pad(s_mat, ((0, Lp - L), (0, Lp - L)))

    # Folded conv weights.  NOTE: parameter transforms — in a real model these
    # should be precomputed/cached outside the per-step hot path.
    w3_rows = _conv3x3_row_matrices(
        params["w3"].astype(jnp.float32), W, C, Lp).astype(matmul_dtype)
    w1_mat = jnp.pad(jnp.kron(jnp.eye(W, dtype=jnp.float32),
                              params["w1"].astype(jnp.float32)),
                     ((0, Lp - L), (0, Lp - L))).astype(matmul_dtype)

    # Generation-aware VMEM budgeting (~30% headroom for compiler temporaries).
    w_item = jnp.dtype(matmul_dtype).itemsize
    act_bytes = M_rows * Lp * 4
    weight_bytes = 4 * Lp * Lp * w_item + (Lp * Lp + 8 * Lp) * 4
    live_bytes = 8 * act_bytes + weight_bytes
    budget = int(_vmem_capacity_bytes() * 0.70)
    assert live_bytes <= budget, (
        f"resblock_forward: ~{live_bytes / 2**20:.1f} MiB of live VMEM vs "
        f"~{budget / 2**20:.1f} MiB budget; this shape needs the M-tiled phased "
        "design (see TODO at top of file).")
    vmem_limit = int(min(budget, max(32 << 20, 2 * live_bytes)))

    kernel = _make_kernel(N, H, W, C, M_rows, Lp)
    vmem = pl.BlockSpec(memory_space=pltpu.MemorySpace.VMEM)
    out_rows = pl.pallas_call(
        kernel,
        out_shape=jax.ShapeDtypeStruct((M_rows, Lp), jnp.float32),
        in_specs=[vmem] * 5,
        out_specs=vmem,
        compiler_params=pltpu.CompilerParams(vmem_limit_bytes=vmem_limit),
    )(x_rows, bn_pack, s_mat, w3_rows, w1_mat)

    out = out_rows[:, :L] if Lp != L else out_rows
    return out.reshape(N, H, W, C)


def resblock_forward(x_nchw, params, *, matmul_dtype=jnp.float32):
    """NCHW wrapper (matches the PyTorch module interface)."""
    x_nhwc = jnp.transpose(x_nchw, (0, 2, 3, 1))
    out = resblock_forward_nhwc(x_nhwc, params, matmul_dtype=matmul_dtype)
    return jnp.transpose(out, (0, 3, 1, 2))


def ref_forward(x_nchw, params):
    """Pure-JAX reference (NHWC internally), training-mode BN."""
    x = jnp.transpose(x_nchw, (0, 2, 3, 1))

    def bn(v, g, b):
        mean = v.mean(axis=(0, 1, 2), keepdims=True)
        var = ((v - mean) ** 2).mean(axis=(0, 1, 2), keepdims=True)
        return (v - mean) * jax.lax.rsqrt(var + BN_EPS) * g.reshape(1, 1, 1, -1) \
            + b.reshape(1, 1, 1, -1)

    h = jax.nn.relu(bn(x, params["g1"], params["be1"]))
    h = jax.lax.conv_general_dilated(
        h, params["w3"], window_strides=(1, 1), padding="SAME",
        dimension_numbers=("NHWC", "HWIO", "NHWC")) + params["b3"].reshape(1, 1, 1, -1)
    h = jax.nn.relu(bn(h, params["g2"], params["be2"]))
    h = jnp.einsum("nhwc,cd->nhwd", h, params["w1"]) + params["bc1"].reshape(1, 1, 1, -1)
    h = bn(h, params["g3"], params["be3"])
    return jnp.transpose(jax.nn.relu(h + x), (0, 3, 1, 2))


def init_params(key, C):
    # w3: (3, 3, C_in, C_out) HWIO; w1: (C_in, C_out).
    ks = jax.random.split(key, 10)
    f32 = jnp.float32
    return {
        "g1": (1.0 + 0.1 * jax.random.normal(ks[0], (C,))).astype(f32),
        "be1": (0.1 * jax.random.normal(ks[1], (C,))).astype(f32),
        "w3": (0.1 * jax.random.normal(ks[2], (3, 3, C, C))).astype(f32),
        "b3": (0.1 * jax.random.normal(ks[3], (C,))).astype(f32),
        "g2": (1.0 + 0.1 * jax.random.normal(ks[4], (C,))).astype(f32),
        "be2": (0.1 * jax.random.normal(ks[5], (C,))).astype(f32),
        "w1": (0.1 * jax.random.normal(ks[6], (C, C))).astype(f32),
        "bc1": (0.1 * jax.random.normal(ks[7], (C,))).astype(f32),
        "g3": (1.0 + 0.1 * jax.random.normal(ks[8], (C,))).astype(f32),
        "be3": (0.1 * jax.random.normal(ks[9], (C,))).astype(f32),
    }


if __name__ == "__main__":
    key = jax.random.PRNGKey(0)
    pkey, xkey = jax.random.split(key)

    # inchannel == outchannel (required by the residual add); W*C = 128 exactly
    # fills one lane tile, so there is zero padding waste at this shape.
    N, C, H, W = 2, 8, 16, 16
    params = init_params(pkey, C)
    x = jax.random.normal(xkey, (N, C, H, W), jnp.float32)

    ref = ref_forward(x, params)

    # f32 matmul-operand path (bit-exact layout rearrangement of the math).
    out = jax.block_until_ready(resblock_forward(x, params))
    assert out.shape == ref.shape == (N, C, H, W)
    err = float(jnp.max(jnp.abs(out - ref)))
    assert jnp.allclose(out, ref, rtol=1e-4, atol=1e-4), f"f32 max abs err = {err}"

    # bf16 MXU-operand path (v6e/v7x recommendation): f32 accumulation and
    # f32 BN statistics, only the matmul operands are rounded.
    out_bf16 = jax.block_until_ready(
        resblock_forward(x, params, matmul_dtype=jnp.bfloat16))
    err_bf16 = float(jnp.max(jnp.abs(out_bf16 - ref)))
    assert jnp.allclose(out_bf16, ref, rtol=5e-2, atol=5e-2), \
        f"bf16 max abs err = {err_bf16}"

    print("KERNEL_OK")
</pallas_src>

<mosaic_0001>
module attributes {stable_mosaic.version = 11 : i64} {
  func.func @kernel(%arg0: memref<32x128xf32, #tpu.memory_space<vmem>>, %arg1: memref<8x128xf32, #tpu.memory_space<vmem>>, %arg2: memref<128x128xf32, #tpu.memory_space<vmem>>, %arg3: memref<384x128xf32, #tpu.memory_space<vmem>>, %arg4: memref<128x128xf32, #tpu.memory_space<vmem>>, %arg5: memref<32x128xf32, #tpu.memory_space<vmem>>) attributes {dimension_semantics = [], scalar_prefetch = 0 : i64, scratch_operands = 0 : i64, tpu.core_type = #tpu.core_type<tc>} {
    %c0 = arith.constant 0 : index
    %c0_0 = arith.constant 0 : index
    %0 = vector.load %arg2[%c0, %c0_0] : memref<128x128xf32, #tpu.memory_space<vmem>>, vector<128x128xf32>
    %c0_1 = arith.constant 0 : index
    %c0_2 = arith.constant 0 : index
    %1 = vector.load %arg1[%c0_1, %c0_2] : memref<8x128xf32, #tpu.memory_space<vmem>>, vector<8x128xf32>
    %2 = vector.extract_strided_slice %1 {offsets = [0, 0], sizes = [1, 128], strides = [1, 1]} : vector<8x128xf32> to vector<1x128xf32>
    %3 = vector.extract_strided_slice %1 {offsets = [1, 0], sizes = [1, 128], strides = [1, 1]} : vector<8x128xf32> to vector<1x128xf32>
    %4 = vector.extract_strided_slice %1 {offsets = [2, 0], sizes = [1, 128], strides = [1, 1]} : vector<8x128xf32> to vector<1x128xf32>
    %5 = vector.extract_strided_slice %1 {offsets = [3, 0], sizes = [1, 128], strides = [1, 1]} : vector<8x128xf32> to vector<1x128xf32>
    %6 = vector.extract_strided_slice %1 {offsets = [4, 0], sizes = [1, 128], strides = [1, 1]} : vector<8x128xf32> to vector<1x128xf32>
    %7 = vector.extract_strided_slice %1 {offsets = [5, 0], sizes = [1, 128], strides = [1, 1]} : vector<8x128xf32> to vector<1x128xf32>
    %8 = vector.extract_strided_slice %1 {offsets = [6, 0], sizes = [1, 128], strides = [1, 1]} : vector<8x128xf32> to vector<1x128xf32>
    %9 = vector.extract_strided_slice %1 {offsets = [7, 0], sizes = [1, 128], strides = [1, 1]} : vector<8x128xf32> to vector<1x128xf32>
    %c0_3 = arith.constant 0 : index
    %c0_4 = arith.constant 0 : index
    %10 = vector.load %arg0[%c0_3, %c0_4] : memref<32x128xf32, #tpu.memory_space<vmem>>, vector<32x128xf32>
    %cst = arith.constant dense<0.000000e+00> : vector<128xf32>
    %11 = vector.multi_reduction <add>, %10, %cst [0] : vector<32x128xf32> to vector<128xf32>
    %12 = vector.shape_cast %11 : vector<128xf32> to vector<1x128xf32>
    %cst_5 = arith.constant dense<0.000000e+00> : vector<1x128xf32>
    %13 = tpu.matmul %12, %0, %cst_5 {dimension_numbers = #tpu.dot_dimension_numbers<[1], [0], [0], [1], [0, 0, 1, 1], [], []>} : vector<1x128xf32>, vector<128x128xf32>, vector<1x128xf32> -> vector<1x128xf32>
    %cst_6 = arith.constant 0.001953125 : f32
    %14 = vector.broadcast %cst_6 : f32 to vector<1x128xf32>
    %15 = arith.mulf %13, %14 : vector<1x128xf32>
    %16 = vector.broadcast %15 : vector<1x128xf32> to vector<32x128xf32>
    %17 = arith.subf %10, %16 : vector<32x128xf32>
    %18 = arith.mulf %17, %17 : vector<32x128xf32>
    %cst_7 = arith.constant dense<0.000000e+00> : vector<128xf32>
    %19 = vector.multi_reduction <add>, %18, %cst_7 [0] : vector<32x128xf32> to vector<128xf32>
    %20 = vector.shape_cast %19 : vector<128xf32> to vector<1x128xf32>
    %cst_8 = arith.constant dense<0.000000e+00> : vector<1x128xf32>
    %21 = tpu.matmul %20, %0, %cst_8 {dimension_numbers = #tpu.dot_dimension_numbers<[1], [0], [0], [1], [0, 0, 1, 1], [], []>} : vector<1x128xf32>, vector<128x128xf32>, vector<1x128xf32> -> vector<1x128xf32>
    %cst_9 = arith.constant 0.001953125 : f32
    %22 = vector.broadcast %cst_9 : f32 to vector<1x128xf32>
    %23 = arith.mulf %21, %22 : vector<1x128xf32>
    %cst_10 = arith.constant 9.99999974E-6 : f32
    %24 = vector.broadcast %cst_10 : f32 to vector<1x128xf32>
    %25 = arith.addf %23, %24 : vector<1x128xf32>
    %26 = math.rsqrt %25 : vector<1x128xf32>
    %27 = vector.broadcast %26 : vector<1x128xf32> to vector<32x128xf32>
    %28 = arith.mulf %17, %27 : vector<32x128xf32>
    %29 = vector.broadcast %2 : vector<1x128xf32> to vector<32x128xf32>
    %30 = arith.mulf %28, %29 : vector<32x128xf32>
    %31 = vector.broadcast %3 : vector<1x128xf32> to vector<32x128xf32>
    %32 = arith.addf %30, %31 : vector<32x128xf32>
    %cst_11 = arith.constant 0.000000e+00 : f32
    %33 = vector.broadcast %cst_11 : f32 to vector<32x128xf32>
    %34 = arith.maximumf %32, %33 : vector<32x128xf32>
    %35 = tpu.iota {dimensions = array<i32: 0>} : vector<32x1xi32>
    %c16_i32 = arith.constant 16 : i32
    %c0_i32 = arith.constant 0 : i32
    %36 = arith.cmpi eq, %c16_i32, %c0_i32 : i32
    %c1_i32 = arith.constant 1 : i32
    %37 = arith.select %36, %c1_i32, %c16_i32 : i32
    %38 = vector.broadcast %37 : i32 to vector<32x1xi32>
    %39 = arith.remsi %35, %38 : vector<32x1xi32>
    %c0_i32_12 = arith.constant 0 : i32
    %40 = vector.broadcast %c0_i32_12 : i32 to vector<32x1xi32>
    %41 = arith.cmpi ne, %39, %40 : vector<32x1xi32>
    %c0_i32_13 = arith.constant 0 : i32
    %42 = vector.broadcast %c0_i32_13 : i32 to vector<32x1xi32>
    %43 = arith.cmpi slt, %39, %42 : vector<32x1xi32>
    %c0_i32_14 = arith.constant 0 : i32
    %44 = arith.cmpi slt, %37, %c0_i32_14 : i32
    %45 = vector.broadcast %44 : i1 to vector<32x1xi1>
    %46 = vector.broadcast %45 : vector<32x1xi1> to vector<32x1xi1>
    %47 = arith.xori %43, %46 : vector<32x1xi1>
    %48 = arith.andi %47, %41 : vector<32x1xi1>
    %49 = vector.broadcast %37 : i32 to vector<32x1xi32>
    %50 = arith.addi %39, %49 : vector<32x1xi32>
    %51 = arith.select %48, %50, %39 : vector<32x1xi1>, vector<32x1xi32>
    %c1_i32_15 = arith.constant 1 : i32
    %52 = vector.broadcast %c1_i32_15 : i32 to vector<32x1xi32>
    %53 = arith.cmpi sge, %51, %52 : vector<32x1xi32>
    %54 = arith.extui %53 : vector<32x1xi1> to vector<32x1xi32>
    %55 = arith.sitofp %54 : vector<32x1xi32> to vector<32x1xf32>
    %c15_i32 = arith.constant 15 : i32
    %56 = vector.broadcast %c15_i32 : i32 to vector<32x1xi32>
    %57 = arith.cmpi slt, %51, %56 : vector<32x1xi32>
    %58 = arith.extui %57 : vector<32x1xi1> to vector<32x1xi32>
    %59 = arith.sitofp %58 : vector<32x1xi32> to vector<32x1xf32>
    %cst_16 = arith.constant 0.000000e+00 : f32
    %60 = vector.broadcast %cst_16 : f32 to vector<32x128xf32>
    %c1_i32_17 = arith.constant 1 : i32
    %61 = tpu.dynamic_rotate %34 by %c1_i32_17 dim 0 : vector<32x128xf32>, i32 -> vector<32x128xf32>
    %62 = vector.broadcast %55 : vector<32x1xf32> to vector<32x128xf32>
    %63 = arith.mulf %61, %62 : vector<32x128xf32>
    %c0_18 = arith.constant 0 : index
    %c0_19 = arith.constant 0 : index
    %64 = vector.load %arg3[%c0_18, %c0_19] : memref<384x128xf32, #tpu.memory_space<vmem>>, vector<128x128xf32>
    %cst_20 = arith.constant dense<0.000000e+00> : vector<32x128xf32>
    %65 = tpu.matmul %63, %64, %cst_20 {dimension_numbers = #tpu.dot_dimension_numbers<[1], [0], [0], [1], [0, 0, 1, 1], [], []>} : vector<32x128xf32>, vector<128x128xf32>, vector<32x128xf32> -> vector<32x128xf32>
    %66 = arith.addf %60, %65 : vector<32x128xf32>
    %c128 = arith.constant 128 : index
    %c0_21 = arith.constant 0 : index
    %67 = vector.load %arg3[%c128, %c0_21] : memref<384x128xf32, #tpu.memory_space<vmem>>, vector<128x128xf32>
    %cst_22 = arith.constant dense<0.000000e+00> : vector<32x128xf32>
    %68 = tpu.matmul %34, %67, %cst_22 {dimension_numbers = #tpu.dot_dimension_numbers<[1], [0], [0], [1], [0, 0, 1, 1], [], []>} : vector<32x128xf32>, vector<128x128xf32>, vector<32x128xf32> -> vector<32x128xf32>
    %69 = arith.addf %66, %68 : vector<32x128xf32>
    %c31_i32 = arith.constant 31 : i32
    %70 = tpu.dynamic_rotate %34 by %c31_i32 dim 0 : vector<32x128xf32>, i32 -> vector<32x128xf32>
    %71 = vector.broadcast %59 : vector<32x1xf32> to vector<32x128xf32>
    %72 = arith.mulf %70, %71 : vector<32x128xf32>
    %c256 = arith.constant 256 : index
    %c0_23 = arith.constant 0 : index
    %73 = vector.load %arg3[%c256, %c0_23] : memref<384x128xf32, #tpu.memory_space<vmem>>, vector<128x128xf32>
    %cst_24 = arith.constant dense<0.000000e+00> : vector<32x128xf32>
    %74 = tpu.matmul %72, %73, %cst_24 {dimension_numbers = #tpu.dot_dimension_numbers<[1], [0], [0], [1], [0, 0, 1, 1], [], []>} : vector<32x128xf32>, vector<128x128xf32>, vector<32x128xf32> -> vector<32x128xf32>
    %75 = arith.addf %69, %74 : vector<32x128xf32>
    %76 = vector.broadcast %4 : vector<1x128xf32> to vector<32x128xf32>
    %77 = arith.addf %75, %76 : vector<32x128xf32>
    %cst_25 = arith.constant dense<0.000000e+00> : vector<128xf32>
    %78 = vector.multi_reduction <add>, %77, %cst_25 [0] : vector<32x128xf32> to vector<128xf32>
    %79 = vector.shape_cast %78 : vector<128xf32> to vector<1x128xf32>
    %cst_26 = arith.constant dense<0.000000e+00> : vector<1x128xf32>
    %80 = tpu.matmul %79, %0, %cst_26 {dimension_numbers = #tpu.dot_dimension_numbers<[1], [0], [0], [1], [0, 0, 1, 1], [], []>} : vector<1x128xf32>, vector<128x128xf32>, vector<1x128xf32> -> vector<1x128xf32>
    %cst_27 = arith.constant 0.001953125 : f32
    %81 = vector.broadcast %cst_27 : f32 to vector<1x128xf32>
    %82 = arith.mulf %80, %81 : vector<1x128xf32>
    %83 = vector.broadcast %82 : vector<1x128xf32> to vector<32x128xf32>
    %84 = arith.subf %77, %83 : vector<32x128xf32>
    %85 = arith.mulf %84, %84 : vector<32x128xf32>
    %cst_28 = arith.constant dense<0.000000e+00> : vector<128xf32>
    %86 = vector.multi_reduction <add>, %85, %cst_28 [0] : vector<32x128xf32> to vector<128xf32>
    %87 = vector.shape_cast %86 : vector<128xf32> to vector<1x128xf32>
    %cst_29 = arith.constant dense<0.000000e+00> : vector<1x128xf32>
    %88 = tpu.matmul %87, %0, %cst_29 {dimension_numbers = #tpu.dot_dimension_numbers<[1], [0], [0], [1], [0, 0, 1, 1], [], []>} : vector<1x128xf32>, vector<128x128xf32>, vector<1x128xf32> -> vector<1x128xf32>
    %cst_30 = arith.constant 0.001953125 : f32
    %89 = vector.broadcast %cst_30 : f32 to vector<1x128xf32>
    %90 = arith.mulf %88, %89 : vector<1x128xf32>
    %cst_31 = arith.constant 9.99999974E-6 : f32
    %91 = vector.broadcast %cst_31 : f32 to vector<1x128xf32>
    %92 = arith.addf %90, %91 : vector<1x128xf32>
    %93 = math.rsqrt %92 : vector<1x128xf32>
    %94 = vector.broadcast %93 : vector<1x128xf32> to vector<32x128xf32>
    %95 = arith.mulf %84, %94 : vector<32x128xf32>
    %96 = vector.broadcast %5 : vector<1x128xf32> to vector<32x128xf32>
    %97 = arith.mulf %95, %96 : vector<32x128xf32>
    %98 = vector.broadcast %6 : vector<1x128xf32> to vector<32x128xf32>
    %99 = arith.addf %97, %98 : vector<32x128xf32>
    %cst_32 = arith.constant 0.000000e+00 : f32
    %100 = vector.broadcast %cst_32 : f32 to vector<32x128xf32>
    %101 = arith.maximumf %99, %100 : vector<32x128xf32>
    %c0_33 = arith.constant 0 : index
    %c0_34 = arith.constant 0 : index
    %102 = vector.load %arg4[%c0_33, %c0_34] : memref<128x128xf32, #tpu.memory_space<vmem>>, vector<128x128xf32>
    %cst_35 = arith.constant dense<0.000000e+00> : vector<32x128xf32>
    %103 = tpu.matmul %101, %102, %cst_35 {dimension_numbers = #tpu.dot_dimension_numbers<[1], [0], [0], [1], [0, 0, 1, 1], [], []>} : vector<32x128xf32>, vector<128x128xf32>, vector<32x128xf32> -> vector<32x128xf32>
    %104 = vector.broadcast %7 : vector<1x128xf32> to vector<32x128xf32>
    %105 = arith.addf %103, %104 : vector<32x128xf32>
    %cst_36 = arith.constant dense<0.000000e+00> : vector<128xf32>
    %106 = vector.multi_reduction <add>, %105, %cst_36 [0] : vector<32x128xf32> to vector<128xf32>
    %107 = vector.shape_cast %106 : vector<128xf32> to vector<1x128xf32>
    %cst_37 = arith.constant dense<0.000000e+00> : vector<1x128xf32>
    %108 = tpu.matmul %107, %0, %cst_37 {dimension_numbers = #tpu.dot_dimension_numbers<[1], [0], [0], [1], [0, 0, 1, 1], [], []>} : vector<1x128xf32>, vector<128x128xf32>, vector<1x128xf32> -> vector<1x128xf32>
    %cst_38 = arith.constant 0.001953125 : f32
    %109 = vector.broadcast %cst_38 : f32 to vector<1x128xf32>
    %110 = arith.mulf %108, %109 : vector<1x128xf32>
    %111 = vector.broadcast %110 : vector<1x128xf32> to vector<32x128xf32>
    %112 = arith.subf %105, %111 : vector<32x128xf32>
    %113 = arith.mulf %112, %112 : vector<32x128xf32>
    %cst_39 = arith.constant dense<0.000000e+00> : vector<128xf32>
    %114 = vector.multi_reduction <add>, %113, %cst_39 [0] : vector<32x128xf32> to vector<128xf32>
    %115 = vector.shape_cast %114 : vector<128xf32> to vector<1x128xf32>
    %cst_40 = arith.constant dense<0.000000e+00> : vector<1x128xf32>
    %116 = tpu.matmul %115, %0, %cst_40 {dimension_numbers = #tpu.dot_dimension_numbers<[1], [0], [0], [1], [0, 0, 1, 1], [], []>} : vector<1x128xf32>, vector<128x128xf32>, vector<1x128xf32> -> vector<1x128xf32>
    %cst_41 = arith.constant 0.001953125 : f32
    %117 = vector.broadcast %cst_41 : f32 to vector<1x128xf32>
    %118 = arith.mulf %116, %117 : vector<1x128xf32>
    %cst_42 = arith.constant 9.99999974E-6 : f32
    %119 = vector.broadcast %cst_42 : f32 to vector<1x128xf32>
    %120 = arith.addf %118, %119 : vector<1x128xf32>
    %121 = math.rsqrt %120 : vector<1x128xf32>
    %122 = vector.broadcast %121 : vector<1x128xf32> to vector<32x128xf32>
    %123 = arith.mulf %112, %122 : vector<32x128xf32>
    %124 = vector.broadcast %8 : vector<1x128xf32> to vector<32x128xf32>
    %125 = arith.mulf %123, %124 : vector<32x128xf32>
    %126 = vector.broadcast %9 : vector<1x128xf32> to vector<32x128xf32>
    %127 = arith.addf %125, %126 : vector<32x128xf32>
    %c0_43 = arith.constant 0 : index
    %c0_44 = arith.constant 0 : index
    %128 = vector.load %arg0[%c0_43, %c0_44] : memref<32x128xf32, #tpu.memory_space<vmem>>, vector<32x128xf32>
    %129 = arith.addf %127, %128 : vector<32x128xf32>
    %cst_45 = arith.constant 0.000000e+00 : f32
    %130 = vector.broadcast %cst_45 : f32 to vector<32x128xf32>
    %131 = arith.maximumf %129, %130 : vector<32x128xf32>
    %c0_46 = arith.constant 0 : index
    %c0_47 = arith.constant 0 : index
    %132 = vector.load %arg5[%c0_46, %c0_47] : memref<32x128xf32, #tpu.memory_space<vmem>>, vector<32x128xf32>
    tpu.vector_store %arg5[%c0_46, %c0_47], %131 {strides = array<i32>} : memref<32x128xf32, #tpu.memory_space<vmem>>, vector<32x128xf32>,
    return
  }
}

</mosaic_0001>

<bundles_post_ra>
// kernel: tpu_custom_call.1
= control target key start
LH: loop header
LB: loop body
LE: loop exit
PB: predicated region body
PF: predicated region fallthrough
CT: control target
= control target key end

     0   :  { %10 = vsyncpa [#allocation3], 0  ;;  %s2640_s0 = inlined_call_operand.hbm [shape: f32[32,128], index: 0, kind: input, shape index: {}]   ;;  %s2641_s1 = inlined_call_operand.hbm [shape: f32[8,128], index: 1, kind: input, shape index: {}]   ;;  %s2642_s2 = inlined_call_operand.hbm [shape: f32[128,128], index: 2, kind: input, shape index: {}]   ;;  %s2643_s3 = inlined_call_operand.hbm [shape: f32[384,128], index: 3, kind: input, shape index: {}]   ;;  %s2644_s4 = inlined_call_operand.hbm [shape: f32[128,128], index: 4, kind: input, shape index: {}]   ;;  %s2645_s5 = inlined_call_operand.hbm [shape: f32[32,128], index: 5, kind: output, shape index: {}]  }
   0x1   :  { %11 = vsyncpa [#allocation6], 0 }
   0x2   :  { %12 = vsyncpa [#allocation9], 0 }
   0x3   :  { %13 = vsyncpa [#allocation4], 0  ;;  %s2253_s18 = smov [#allocation5]   ;;  %s2113_s22 = scalar_lea.hbm %s2641_s1, 128 }
   0x4   :  { %s32_s19 = sshll.u32 %s2253_s18, 4  ;;  %p2114_p0 = scmp.ne.s32.totalorder %s2641_s1, %s2113_s22  ;;  %s33_s19 = int_to_ptr.vmem [resolvable:$true] %s32_s19 }
   0x5   :  { %p2117_p1 = scmp.lt.u32.totalorder %s2113_s22, %s2641_s1 }
   0x7   :  { %p2119_p2 = pnand %p2117_p1, %p2114_p0 }
   0x9   :  { %2122 = shalt.err (!%p2119_p2)
}
   0xa   :  { %s2123_s27 = scalar_lea.vmem %s33_s19, 128  ;;  %p2128_p4 = scmp.lt.s32.totalorder %s33_s19, %s33_s19 }
   0xb   :  { %p2124_p3 = scmp.ne.s32.totalorder %s33_s19, %s2123_s27  ;;  %p2129_p5 = scmp.lt.s32.totalorder %s2123_s27, %s2123_s27 }
   0xd   :  { %p2130_p6 = por %p2129_p5, %p2128_p4 }
   0xf   :  { %p2131_p7 = pnand %p2130_p6, %p2124_p3 }
  0x11   :  { %2134 = shalt.err (!%p2131_p7)
}
  0x12   :  { %35 = dma.hbm_to_vmem [thread:$0]  %s2641_s1, 128, %s33_s19, [#allocation6]  }
  0x13   :  { %s2254_s30 = smov [#allocation8]   ;;  %s2255_s7 = smov [#allocation2]  }
  0x14   :  { %s53_s6 = sshll.u32 %s2254_s30, 4  ;;  %s19_s8 = sshll.u32 %s2255_s7, 4  ;;  %s54_s6 = int_to_ptr.vmem [resolvable:$true] %s53_s6  ;;  %s20_s8 = int_to_ptr.vmem [resolvable:$true] %s19_s8 }
  0x15   :  { %s2135_s11 = scalar_lea.hbm %s2643_s3, 6144 }
  0x16   :  { %p2136_p8 = scmp.ne.s32.totalorder %s2643_s3, %s2135_s11  ;;  %p2139_p9 = scmp.lt.u32.totalorder %s2135_s11, %s2643_s3 }
  0x18   :  { %p2141_p10 = pnand %p2139_p9, %p2136_p8 }
  0x1a   :  { %2144 = shalt.err (!%p2141_p10)
}
  0x1b   :  { %s2145_s1 = scalar_lea.vmem %s54_s6, 6144  ;;  %p2150_p12 = scmp.lt.s32.totalorder %s54_s6, %s54_s6 }
  0x1c   :  { %p2146_p11 = scmp.ne.s32.totalorder %s54_s6, %s2145_s1  ;;  %p2151_p13 = scmp.lt.s32.totalorder %s2145_s1, %s2145_s1 }
  0x1e   :  { %p2152_p0 = por %p2151_p13, %p2150_p12 }
  0x20   :  { %p2153_p1 = pnand %p2152_p0, %p2146_p11 }
  0x22   :  { %2156 = shalt.err (!%p2153_p1)
}
  0x23   :  { %s2256_s16 = smov 128   ;;  %s2257_s17 = smov 8  }
  0x24   :  { %59 = dma.hbm_to_vmem [thread:$0]  %s2643_s3, 6144, %s54_s6, [#allocation9], %s2256_s16, %s2256_s16, %s2257_s17  }
  0x25   :  { %s2157_s22 = scalar_lea.hbm %s2640_s0, 512 }
  0x26   :  { %p2158_p2 = scmp.ne.s32.totalorder %s2640_s0, %s2157_s22  ;;  %p2161_p3 = scmp.lt.u32.totalorder %s2157_s22, %s2640_s0 }
  0x28   :  { %p2163_p4 = pnand %p2161_p3, %p2158_p2 }
  0x2a   :  { %2166 = shalt.err (!%p2163_p4)
}
  0x2b   :  { %s2167_s27 = scalar_lea.vmem %s20_s8, 512  ;;  %p2172_p6 = scmp.lt.s32.totalorder %s20_s8, %s20_s8 }
  0x2c   :  { %p2168_p5 = scmp.ne.s32.totalorder %s20_s8, %s2167_s27  ;;  %p2173_p7 = scmp.lt.s32.totalorder %s2167_s27, %s2167_s27 }
  0x2e   :  { %p2174_p8 = por %p2173_p7, %p2172_p6 }
  0x30   :  { %p2175_p9 = pnand %p2174_p8, %p2168_p5 }
  0x32   :  { %2178 = shalt.err (!%p2175_p9)
}
  0x33   :  { %25 = dma.hbm_to_vmem [thread:$0]  %s2640_s0, 512, %s20_s8, [#allocation3], %s2256_s16, %s2256_s16, %s2257_s17  }
  0x34   :  { %s2258_s29 = smov [#allocation7]   ;;  %s2259_s6 = smov [#allocation10]  }
  0x35   :  { %s41_s30 = sshll.u32 %s2258_s29, 4  ;;  %s65_s7 = sshll.u32 %s2259_s6, 4  ;;  %s42_s30 = int_to_ptr.vmem [resolvable:$true] %s41_s30  ;;  %s66_s7 = int_to_ptr.vmem [resolvable:$true] %s65_s7 }
  0x36   :  { %s2179_s11 = scalar_lea.hbm %s2642_s2, 2048 }
  0x37   :  { %p2180_p10 = scmp.ne.s32.totalorder %s2642_s2, %s2179_s11  ;;  %p2183_p11 = scmp.lt.u32.totalorder %s2179_s11, %s2642_s2 }
  0x39   :  { %p2185_p12 = pnand %p2183_p11, %p2180_p10 }
  0x3b   :  { %2188 = shalt.err (!%p2185_p12)
}
  0x3c   :  { %s2189_s0 = scalar_lea.vmem %s42_s30, 2048  ;;  %p2194_p0 = scmp.lt.s32.totalorder %s42_s30, %s42_s30 }
  0x3d   :  { %p2190_p13 = scmp.ne.s32.totalorder %s42_s30, %s2189_s0  ;;  %p2195_p1 = scmp.lt.s32.totalorder %s2189_s0, %s2189_s0 }
  0x3f   :  { %p2196_p2 = por %p2195_p1, %p2194_p0 }
  0x41   :  { %p2197_p3 = pnand %p2196_p2, %p2190_p13 }
  0x43   :  { %2200 = shalt.err (!%p2197_p3)
}
  0x44   :  { %47 = dma.hbm_to_vmem [thread:$0]  %s2642_s2, 2048, %s42_s30, [#allocation6], %s2256_s16, %s2256_s16, %s2257_s17  }
  0x45   :  { %s2201_s20 = scalar_lea.hbm %s2644_s4, 2048 }
  0x46   :  { %p2202_p4 = scmp.ne.s32.totalorder %s2644_s4, %s2201_s20  ;;  %p2205_p5 = scmp.lt.u32.totalorder %s2201_s20, %s2644_s4 }
  0x48   :  { %p2207_p6 = pnand %p2205_p5, %p2202_p4 }
  0x4a   :  { %2210 = shalt.err (!%p2207_p6)
}
  0x4b   :  { %s2211_s25 = scalar_lea.vmem %s66_s7, 2048  ;;  %p2216_p8 = scmp.lt.s32.totalorder %s66_s7, %s66_s7 }
  0x4c   :  { %p2212_p7 = scmp.ne.s32.totalorder %s66_s7, %s2211_s25  ;;  %p2217_p9 = scmp.lt.s32.totalorder %s2211_s25, %s2211_s25 }
  0x4e   :  { %p2218_p10 = por %p2217_p9, %p2216_p8 }
  0x50   :  { %p2219_p11 = pnand %p2218_p10, %p2212_p7 }
  0x52   :  { %2222 = shalt.err (!%p2219_p11)
}
  0x53   :  { %71 = dma.hbm_to_vmem [thread:$0]  %s2644_s4, 2048, %s66_s7, [#allocation9], %s2256_s16, %s2256_s16, %s2257_s17  }
  0x54   :  { %2245 = dma.done.wait [#allocation3], 512  }
  0x55   :  { %2246 = vsyncadd [#allocation3], 4294966784 }
  0x56   :  { %2247 = dma.done.wait [#allocation6], 2176  }
  0x57   :  { %2248 = vsyncadd [#allocation6], 4294965120 }
  0x58   :  { %2249 = dma.done.wait [#allocation9], 8192  }
  0x59   :  { %2250 = vsyncadd [#allocation9], 4294959104  ;;  %v2260_v0 = vmov 0.0|0.0   ;;  %vm2261_vm0 = vmmov 0   ;;  %v2262_v1 = vmov 0.0   ;;  %v87_v2 = vld [vmem:[#allocation7] sm:$0xff]  ;;  %v188_v45 = vlaneseq }
  0x5a   :  { %1812 = vmatprep.subr.bf16.mxu0 %v2260_v0  ;;  %1482 = vmatprep.mubr.msk.f32.mxu0 %vm2261_vm0, %v2262_v1  ;;  %v88_v3 = vld [vmem:[#allocation7 + $0x8] sm:$0xff]  ;;  %v89_v4 = vld [vmem:[#allocation7 + $0x10] sm:$0xff]  ;;  %v90_v6 = vld [vmem:[#allocation7 + $0x18] sm:$0xff]  ;;  %s2263_s4 = smov [#allocation11]  }
  0x5b   :  { %1836 = vmatprep.subr.bf16.mxu1 %v2260_v0  ;;  %1517 = vmatprep.mubr.msk.f32.mxu1 %vm2261_vm0, %v2262_v1  ;;  %v2372_v5 = vpack.c.bf16 %v88_v3, %v87_v2  ;;  %v2375_v7 = vpack.c.bf16 %v90_v6, %v89_v4  ;;  %v91_v8 = vld [vmem:[#allocation7 + $0x20] sm:$0xff]  ;;  %v92_v9 = vld [vmem:[#allocation7 + $0x28] sm:$0xff]  ;;  %v2380_v10 = vld [vmem:[#allocation2] sm:$0xff]  ;;  %v2431_v46 = vshrl.u32 %v188_v45, 7  ;;  %s1250_s27 = sshll.u32 %s2263_s4, 4  ;;  %s1251_s27 = int_to_ptr.vmem [resolvable:$true] %s1250_s27 }
  0x5c   :  { %v2382_v11 = vld [vmem:[#allocation2 + $0x8] sm:$0xff]  ;;  %v2384_v12 = vld [vmem:[#allocation2 + $0x10] sm:$0xff]  ;;  %v2389_v14 = vpack.c.bf16 %v92_v9, %v91_v8  ;;  %v2391_v15 = vld [vmem:[#allocation2 + $0x18] sm:$0xff]  ;;  %s2223_s3 = scalar_lea.vmem %s1251_s27, 512  ;;  %p2228_p13 = scmp.lt.s32.totalorder %s1251_s27, %s1251_s27 }
  0x5d   :  { %1814 = vmatpush3.bf16.msra.mxu0 %v2372_v5  ;;  %1838 = vmatpush3.bf16.msra.mxu1 %v2372_v5  ;;  %v108_v13 = vadd.f32 %v2382_v11, %v2380_v10  ;;  %v93_v16 = vld [vmem:[#allocation7 + $0x30] sm:$0xff]  ;;  %v94_v17 = vld [vmem:[#allocation7 + $0x38] sm:$0xff]  ;;  %v95_v21 = vld [vmem:[#allocation7 + $0x40] sm:$0xff]  ;;  %v2434_v47 = vsub.s32 0, %v2431_v46  ;;  %vm391_vm2 = vcmp.lt.s32.totalorder %v2431_v46, 1  ;;  %vm606_vm4 = vcmp.lt.s32.totalorder %v2431_v46, 7  ;;  %p2224_p12 = scmp.ne.s32.totalorder %s1251_s27, %s2223_s3  ;;  %p2229_p0 = scmp.lt.s32.totalorder %s2223_s3, %s2223_s3 }
  0x5e   :  { %1815 = vmatprep.subr.bf16.mxu0 %v2260_v0  ;;  %1839 = vmatprep.subr.bf16.mxu1 %v2260_v0  ;;  %v2399_v20 = vpack.c.bf16 %v94_v17, %v93_v16  ;;  %v96_v22 = vld [vmem:[#allocation7 + $0x48] sm:$0xff]  ;;  %v97_v26 = vld [vmem:[#allocation7 + $0x50] sm:$0xff]  ;;  %v98_v27 = vld [vmem:[#allocation7 + $0x58] sm:$0xff] }
  0x5f   :  { %v109_v18 = vadd.f32 %v108_v13, %v2384_v12  ;;  %v2405_v25 = vpack.c.bf16 %v96_v22, %v95_v21  ;;  %v2411_v29 = vpack.c.bf16 %v98_v27, %v97_v26  ;;  %v99_v30 = vld [vmem:[#allocation7 + $0x60] sm:$0xff]  ;;  %v100_v31 = vld [vmem:[#allocation7 + $0x68] sm:$0xff]  ;;  %v101_v34 = vld [vmem:[#allocation7 + $0x70] sm:$0xff]  ;;  %p2230_p1 = por %p2229_p0, %p2228_p13 }
  0x60   :  { %v2417_v33 = vpack.c.bf16 %v100_v31, %v99_v30  ;;  %v102_v35 = vld [vmem:[#allocation7 + $0x78] sm:$0xff]  ;;  %v416_v39 = vld [vmem:[#allocation8 + $0x80] sm:$0xff]  ;;  %v417_v40 = vld [vmem:[#allocation8 + $0x88] sm:$0xff] }
  0x61   :  { %1817 = vmatpush3.bf16.msra.mxu0 %v2375_v7  ;;  %1841 = vmatpush3.bf16.msra.mxu1 %v2375_v7  ;;  %v110_v19 = vadd.f32 %v109_v18, %v2391_v15  ;;  %v2423_v37 = vpack.c.bf16 %v102_v35, %v101_v34  ;;  %v418_v41 = vld [vmem:[#allocation8 + $0x90] sm:$0xff]  ;;  %v1860_v42 = vpack.c.bf16 %v417_v40, %v416_v39  ;;  %v419_v43 = vld [vmem:[#allocation8 + $0x98] sm:$0xff]  ;;  %v420_v9 = vld [vmem:[#allocation8 + $0xa0] sm:$0xff]  ;;  %p2231_p2 = pnand %p2230_p1, %p2224_p12 }
  0x62   :  { %1818 = vmatprep.subr.bf16.mxu0 %v2260_v0  ;;  %1842 = vmatprep.subr.bf16.mxu1 %v2260_v0  ;;  %v1864_v44 = vpack.c.bf16 %v419_v43, %v418_v41  ;;  %v423_v13 = vld [vmem:[#allocation8 + $0xb8] sm:$0xff]  ;;  %v424_v16 = vld [vmem:[#allocation8 + $0xc0] sm:$0xff]  ;;  %v425_v17 = vld [vmem:[#allocation8 + $0xc8] sm:$0xff]  ;;  %v300_v41 = vsub.s32 1, %v2431_v46 }
  0x63   :  { %v111_v23 = vrot.slane %v110_v19, 4  ;;  %v1876_v18 = vpack.c.bf16 %v425_v17, %v424_v16  ;;  %v427_v21 = vld [vmem:[#allocation8 + $0xd8] sm:$0xff]  ;;  %v430_v27 = vld [vmem:[#allocation8 + $0xf0] sm:$0xff]  ;;  %v400_v31 = vld [vmem:[#allocation8] sm:$0xff] }
  0x64   :  { %v2475_v40 = vld [vmem:[#allocation5] sm:$0xff]  ;;  %v406_v17 = vld [vmem:[#allocation8 + $0x30] sm:$0xff] }
  0x65   :  { %1820 = vmatpush3.bf16.msra.mxu0 %v2389_v14  ;;  %1844 = vmatpush3.bf16.msra.mxu1 %v2389_v14  ;;  %v112_v24 = vadd.f32 %v111_v23, %v110_v19  ;;  %v426_v19 = vld [vmem:[#allocation8 + $0xd0] sm:$0xff]  ;;  %v428_v23 = vld [vmem:[#allocation8 + $0xe0] sm:$0xff]  ;;  %v301_v45 = vrot.slane %v2475_v40, %v300_v41  ;;  %v616_v41 = vld [vmem:[#allocation8 + $0x108] sm:$0xff] }
  0x66   :  { %1821 = vmatprep.subr.bf16.mxu0 %v2260_v0  ;;  %1845 = vmatprep.subr.bf16.mxu1 %v2260_v0  ;;  %v1880_v22 = vpack.c.bf16 %v427_v21, %v426_v19  ;;  %v408_v21 = vld [vmem:[#allocation8 + $0x40] sm:$0xff] }
  0x67   :  { %v113_v28 = vrot.slane %v112_v24, 2 }
  0x69   :  { %1823 = vmatpush3.bf16.msra.mxu0 %v2399_v20  ;;  %1847 = vmatpush3.bf16.msra.mxu1 %v2399_v20  ;;  %v114_v32 = vadd.f32 %v113_v28, %v112_v24  ;;  %v429_v24 = vld [vmem:[#allocation8 + $0xe8] sm:$0xff]  ;;  %v431_v28 = vld [vmem:[#allocation8 + $0xf8] sm:$0xff] }
  0x6a   :  { %1824 = vmatprep.subr.bf16.mxu0 %v2260_v0  ;;  %1848 = vmatprep.subr.bf16.mxu1 %v2260_v0  ;;  %v1884_v26 = vpack.c.bf16 %v429_v24, %v428_v23  ;;  %v1888_v30 = vpack.c.bf16 %v431_v28, %v430_v27  ;;  %v410_v24 = vld [vmem:[#allocation8 + $0x50] sm:$0xff]  ;;  %v412_v28 = vld [vmem:[#allocation8 + $0x60] sm:$0xff] }
  0x6b   :  { %v115_v36 = vrot.slane %v114_v32, 1 }
  0x6d   :  { %1826 = vmatpush3.bf16.msra.mxu0 %v2405_v25  ;;  %1850 = vmatpush3.bf16.msra.mxu1 %v2405_v25  ;;  %v116_v38 = vadd.f32 %v115_v36, %v114_v32  ;;  %v401_v32 = vld [vmem:[#allocation8 + $0x8] sm:$0xff] }
  0x6e   :  { %1827 = vmatprep.subr.bf16.mxu0 %v2260_v0  ;;  %1851 = vmatprep.subr.bf16.mxu1 %v2260_v0  ;;  %v1892_v34 = vpack.c.bf16 %v401_v32, %v400_v31  ;;  %v313_v31 = vadd.s32 16, %v2431_v46 }
  0x71   :  { %1829 = vmatpush3.bf16.msra.mxu0 %v2411_v29  ;;  %1853 = vmatpush3.bf16.msra.mxu1 %v2411_v29 }
  0x72   :  { %1830 = vmatprep.subr.bf16.mxu0 %v2260_v0  ;;  %1854 = vmatprep.subr.bf16.mxu1 %v2260_v0 }
  0x75   :  { %1832 = vmatpush3.bf16.msra.mxu0 %v2417_v33  ;;  %1856 = vmatpush3.bf16.msra.mxu1 %v2417_v33 }
  0x76   :  { %1833 = vmatprep.subr.bf16.mxu0 %v2260_v0  ;;  %1857 = vmatprep.subr.bf16.mxu1 %v2260_v0 }
  0x79   :  { %1835 = vmatpush3.bf16.msra.mxu0 %v2423_v37  ;;  %1859 = vmatpush3.bf16.msra.mxu1 %v2423_v37 }
  0x7a   :  { %1956 = vmatprep.subr.bf16.mxu1 %v2260_v0  ;;  %1861 = vmatprep.subr.bf16.mxu0 %v1860_v42 }
  0x7c   :  { %1483 = vmatmul.mubr.f32.vlgmr.msra.gmra.mrb[0].mxu0 %v116_v38 }
  0x7d   :  { %1863 = vmatpush3.bf16.msra.mxu0 %v1860_v42 }
  0x7e   :  { %1865 = vmatprep.subr.bf16.mxu0 %v1864_v44 }
  0x81   :  { %1867 = vmatpush3.bf16.msra.mxu0 %v1864_v44  ;;  %v293_v44 = vrot.slane %v2475_v40, %v2434_v47 }
 0x14f   :  { %v183_v48 = vpop.f32.mrb[0].mxu0 }
 0x150   :  { %v187_v49 = vmul.f32 0.001953125, %v183_v48  ;;  %v1484_v50 = vpop.f32.mrb[1].mxu0 }
 0x152   :  { %v191_v51 = vrot.slane %v187_v49, %v2434_v47 }
 0x154   :  { %v2438_v52 = vsub.f32 %v2380_v10, %v191_v51  ;;  %v2441_v53 = vsub.f32 %v2382_v11, %v191_v51  ;;  %v2444_v54 = vsub.f32 %v2384_v12, %v191_v51  ;;  %v2447_v55 = vsub.f32 %v2391_v15, %v191_v51  ;;  %v421_v10 = vld [vmem:[#allocation8 + $0xa8] sm:$0xff]  ;;  %v422_v12 = vld [vmem:[#allocation8 + $0xb0] sm:$0xff] }
 0x155   :  { %v1868_v11 = vpack.c.bf16 %v421_v10, %v420_v9  ;;  %v1872_v15 = vpack.c.bf16 %v423_v13, %v422_v12  ;;  %v405_v12 = vld [vmem:[#allocation8 + $0x28] sm:$0xff] }
 0x156   :  { %v196_v56 = vmul.f32 %v2438_v52, %v2438_v52  ;;  %v197_v57 = vmul.f32 %v2441_v53, %v2441_v53  ;;  %v198_v58 = vmul.f32 %v2444_v54, %v2444_v54  ;;  %v199_v60 = vmul.f32 %v2447_v55, %v2447_v55 }
 0x157   :  { %1869 = vmatprep.subr.bf16.mxu0 %v1868_v11 }
 0x158   :  { %v200_v59 = vadd.f32 %v197_v57, %v196_v56  ;;  %1871 = vmatpush3.bf16.msra.mxu0 %v1868_v11  ;;  %v319_v56 = vand.u32 15, %v2431_v46  ;;  %v404_v11 = vld [vmem:[#allocation8 + $0x20] sm:$0xff] }
 0x159   :  { %1873 = vmatprep.subr.bf16.mxu0 %v1872_v15  ;;  %v1900_v16 = vpack.c.bf16 %v405_v12, %v404_v11  ;;  %v626_v11 = vld [vmem:[#allocation8 + $0x158] sm:$0xff]  ;;  %v627_v12 = vld [vmem:[#allocation8 + $0x160] sm:$0xff] }
 0x15a   :  { %v201_v61 = vadd.f32 %v200_v59, %v198_v58  ;;  %vm363_vm1 = vcmp.ge.s32.totalorder %v319_v56, 1 }
 0x15b   :  { %v1264_v10 = vsel %vm363_vm1, 1.0, %v2262_v1 }
 0x15c   :  { %v202_v62 = vadd.f32 %v201_v61, %v199_v60  ;;  %1875 = vmatpush3.bf16.msra.mxu0 %v1872_v15 }
 0x15d   :  { %1877 = vmatprep.subr.bf16.mxu0 %v1876_v18 }
 0x15e   :  { %v203_v63 = vrot.slane %v202_v62, 4 }
 0x160   :  { %v204_v2 = vadd.f32 %v203_v63, %v202_v62  ;;  %1879 = vmatpush3.bf16.msra.mxu0 %v1876_v18  ;;  %v407_v18 = vld [vmem:[#allocation8 + $0x38] sm:$0xff] }
 0x161   :  { %1881 = vmatprep.subr.bf16.mxu0 %v1880_v22  ;;  %v1904_v19 = vpack.c.bf16 %v407_v18, %v406_v17  ;;  %v629_v17 = vld [vmem:[#allocation8 + $0x170] sm:$0xff]  ;;  %v630_v18 = vld [vmem:[#allocation8 + $0x178] sm:$0xff] }
 0x162   :  { %v205_v3 = vrot.slane %v204_v2, 2 }
 0x164   :  { %v206_v4 = vadd.f32 %v205_v3, %v204_v2  ;;  %1883 = vmatpush3.bf16.msra.mxu0 %v1880_v22  ;;  %v402_v2 = vld [vmem:[#allocation8 + $0x10] sm:$0xff]  ;;  %v403_v3 = vld [vmem:[#allocation8 + $0x18] sm:$0xff]  ;;  %v409_v22 = vld [vmem:[#allocation8 + $0x48] sm:$0xff] }
 0x165   :  { %1885 = vmatprep.subr.bf16.mxu0 %v1884_v26  ;;  %v1908_v23 = vpack.c.bf16 %v409_v22, %v408_v21  ;;  %v314_v21 = vadd.s32 24, %v2431_v46  ;;  %v1952_v22 = vpack.c.bf16 %v630_v18, %v629_v17 }
 0x166   :  { %v207_v6 = vrot.slane %v206_v4, 1 }
 0x168   :  { %v208_v8 = vadd.f32 %v207_v6, %v206_v4  ;;  %1887 = vmatpush3.bf16.msra.mxu0 %v1884_v26  ;;  %v411_v26 = vld [vmem:[#allocation8 + $0x58] sm:$0xff] }
 0x169   :  { %1889 = vmatprep.subr.bf16.mxu0 %v1888_v30  ;;  %v1912_v27 = vpack.c.bf16 %v411_v26, %v410_v24  ;;  %v340_v24 = vand.u32 15, %v314_v21 }
 0x16a   :  { %1518 = vmatmul.mubr.f32.vlgmr.msra.gmra.mrb[0].mxu1 %v208_v8 }
 0x16b   :  { %1958 = vmatpush3.bf16.msra.mxu1 %v2372_v5  ;;  %1666 = vmatprep.mubr.msk.f32.mxu1 %vm2261_vm0, %v2262_v1  ;;  %vm378_vm6 = vcmp.lt.s32.totalorder %v340_v24, 15  ;;  %v933_v24 = vld [vmem:[#allocation10 + $0x18] sm:$0xff] }
 0x16c   :  { %1959 = vmatprep.subr.bf16.mxu1 %v2260_v0  ;;  %1891 = vmatpush3.bf16.msra.mxu0 %v1888_v30  ;;  %v413_v30 = vld [vmem:[#allocation8 + $0x68] sm:$0xff] }
 0x16d   :  { %1893 = vmatprep.subr.bf16.mxu0 %v1892_v34  ;;  %v1916_v32 = vpack.c.bf16 %v413_v30, %v412_v28 }
 0x16f   :  { %1961 = vmatpush3.bf16.msra.mxu1 %v2375_v7 }
 0x170   :  { %1962 = vmatprep.subr.bf16.mxu1 %v2260_v0 }
 0x173   :  { %1964 = vmatpush3.bf16.msra.mxu1 %v2389_v14 }
 0x174   :  { %1965 = vmatprep.subr.bf16.mxu1 %v2260_v0 }
 0x177   :  { %1967 = vmatpush3.bf16.msra.mxu1 %v2399_v20 }
 0x178   :  { %1968 = vmatprep.subr.bf16.mxu1 %v2260_v0 }
 0x17b   :  { %1970 = vmatpush3.bf16.msra.mxu1 %v2405_v25 }
 0x17c   :  { %1971 = vmatprep.subr.bf16.mxu1 %v2260_v0 }
 0x17f   :  { %1973 = vmatpush3.bf16.msra.mxu1 %v2411_v29 }
 0x180   :  { %1974 = vmatprep.subr.bf16.mxu1 %v2260_v0 }
 0x183   :  { %1976 = vmatpush3.bf16.msra.mxu1 %v2417_v33 }
 0x184   :  { %1977 = vmatprep.subr.bf16.mxu1 %v2260_v0 }
 0x187   :  { %1979 = vmatpush3.bf16.msra.mxu1 %v2423_v37 }
 0x188   :  { %1980 = vmatprep.subr.bf16.mxu1 %v2260_v0 }
 0x23d   :  { %v275_v35 = vpop.f32.mrb[0].mxu1 }
 0x23e   :  { %v279_v36 = vmul.f32 0.001953125, %v275_v35  ;;  %v1519_v38 = vpop.f32.mrb[1].mxu1  ;;  %v415_v35 = vld [vmem:[#allocation8 + $0x78] sm:$0xff] }
 0x240   :  { %v280_v39 = vadd.f32 1e-05, %v279_v36  ;;  %v333_v36 = vand.u32 15, %v313_v31  ;;  %v1267_v31 = vsel %vm378_vm6, 1.0, %v2262_v1 }
 0x242   :  { %2103 = vrsqrt.f32 %v280_v39  ;;  %v615_v39 = vld [vmem:[#allocation8 + $0x100] sm:$0xff]  ;;  %vm365_vm3 = vcmp.ge.s32.totalorder %v333_v36, 1 }
 0x24c   :  { %v2104_v42 = vpop.eup %2103 }
 0x24d   :  { %v285_v43 = vrot.slane %v2104_v42, %v2434_v47 }
 0x24f   :  { %v286_v48 = vmul.f32 %v285_v43, %v2438_v52  ;;  %v287_v49 = vmul.f32 %v285_v43, %v2441_v53  ;;  %v288_v50 = vmul.f32 %v285_v43, %v2444_v54  ;;  %v289_v51 = vmul.f32 %v285_v43, %v2447_v55 }
 0x250   :  { %v1896_v55 = vpack.c.bf16 %v403_v3, %v402_v2  ;;  %v621_v2 = vld [vmem:[#allocation8 + $0x130] sm:$0xff]  ;;  %v622_v3 = vld [vmem:[#allocation8 + $0x138] sm:$0xff] }
 0x251   :  { %v294_v57 = vmul.f32 %v293_v44, %v286_v48  ;;  %v295_v58 = vmul.f32 %v293_v44, %v287_v49  ;;  %v296_v59 = vmul.f32 %v293_v44, %v288_v50  ;;  %v297_v60 = vmul.f32 %v293_v44, %v289_v51  ;;  %v618_v48 = vld [vmem:[#allocation8 + $0x118] sm:$0xff] }
 0x252   :  { %v1924_v44 = vpack.c.bf16 %v616_v41, %v615_v39  ;;  %v1265_v49 = vsel %vm365_vm3, 1.0, %v2262_v1 }
 0x253   :  { %v302_v61 = vadd.f32 %v301_v45, %v294_v57  ;;  %v303_v62 = vadd.f32 %v301_v45, %v295_v58  ;;  %v304_v63 = vadd.f32 %v301_v45, %v296_v59  ;;  %v305_v4 = vadd.f32 %v301_v45, %v297_v60  ;;  %v617_v45 = vld [vmem:[#allocation8 + $0x110] sm:$0xff]  ;;  %v619_v58 = vld [vmem:[#allocation8 + $0x120] sm:$0xff]  ;;  %v620_v59 = vld [vmem:[#allocation8 + $0x128] sm:$0xff] }
 0x254   :  { %v1928_v51 = vpack.c.bf16 %v618_v48, %v617_v45 }
 0x255   :  { %v2487_v52 = vmax.f32 %v302_v61, 0.0  ;;  %v2489_v53 = vmax.f32 %v303_v62, 0.0  ;;  %v2491_v54 = vmax.f32 %v305_v4, 0.0  ;;  %v2496_v8 = vmax.f32 %v304_v63, 0.0 }
 0x256   :  { %v1932_v62 = vpack.c.bf16 %v620_v59, %v619_v58 }
 0x257   :  { %v387_v6 = vrot.slane %v2487_v52, 7  ;;  %1552 = vmatprep.mubr.f32.mxu0 %v2487_v52  ;;  %v390_v9 = vrot.slane %v2491_v54, 7  ;;  %v389_v42 = vrot.slane %v2496_v8, 7  ;;  %v388_v43 = vrot.slane %v2489_v53, 7 }
 0x258   :  { %1553 = vmatmul.mubr.f32.vlgmr.msra.gmra.mrb[2].mxu0 %v2489_v53  ;;  %v602_v60 = vrot.slane %v2487_v52, 1  ;;  %v603_v61 = vrot.slane %v2489_v53, 1  ;;  %v1936_v52 = vpack.c.bf16 %v622_v3, %v621_v2  ;;  %v623_v53 = vld [vmem:[#allocation8 + $0x140] sm:$0xff]  ;;  %v605_v28 = vrot.slane %v2491_v54, 1 }
 0x259   :  { %1895 = vmatpush3.bf16.msra.mxu0 %v1892_v34  ;;  %1555 = vmatprep.mubr.f32.mxu0 %v2496_v8  ;;  %v395_v13 = vsel %vm391_vm2, %v390_v9, %v387_v6  ;;  %v414_v34 = vld [vmem:[#allocation8 + $0x70] sm:$0xff]  ;;  %v393_v50 = vsel %vm391_vm2, %v388_v43, %v389_v42  ;;  %v394_v56 = vsel %vm391_vm2, %v387_v6, %v388_v43 }
 0x25a   :  { %1897 = vmatprep.subr.bf16.mxu0 %v1896_v55  ;;  %v396_v15 = vmul.f32 %v1264_v10, %v395_v13  ;;  %v1920_v38 = vpack.c.bf16 %v415_v35, %v414_v34  ;;  %v398_v57 = vmul.f32 %v1265_v49, %v393_v50  ;;  %v392_v63 = vsel %vm391_vm2, %v389_v42, %v390_v9  ;;  %v625_v10 = vld [vmem:[#allocation8 + $0x150] sm:$0xff]  ;;  %v628_v13 = vld [vmem:[#allocation8 + $0x168] sm:$0xff] }
 0x25b   :  { %v609_v4 = vsel %vm606_vm4, %v602_v60, %v603_v61  ;;  %v1944_v9 = vpack.c.bf16 %v626_v11, %v625_v10 }
 0x25c   :  { %1556 = vmatmul.mubr.f32.gmra.mrb[4].mxu0 %v2491_v54  ;;  %v722_v54 = vsub.s32 2, %v2431_v46 }
 0x25d   :  { %1899 = vmatpush3.bf16.msra.mxu0 %v1896_v55  ;;  %1590 = vmatprep.mubr.f32.mxu0 %v396_v15  ;;  %v624_v55 = vld [vmem:[#allocation8 + $0x148] sm:$0xff]  ;;  %v312_v15 = vadd.s32 8, %v2431_v46 }
 0x25e   :  { %1901 = vmatprep.subr.bf16.mxu0 %v1900_v16  ;;  %v1940_v6 = vpack.c.bf16 %v624_v55, %v623_v53  ;;  %v723_v35 = vrot.slane %v2475_v40, %v722_v54 }
 0x261   :  { %1903 = vmatpush3.bf16.msra.mxu0 %v1900_v16  ;;  %v1948_v16 = vpack.c.bf16 %v628_v13, %v627_v12 }
 0x262   :  { %1905 = vmatprep.subr.bf16.mxu0 %v1904_v19 }
 0x265   :  { %1907 = vmatpush3.bf16.msra.mxu0 %v1904_v19  ;;  %v326_v19 = vand.u32 15, %v312_v15 }
 0x266   :  { %1909 = vmatprep.subr.bf16.mxu0 %v1908_v23 }
 0x267   :  { %vm376_vm5 = vcmp.lt.s32.totalorder %v326_v19, 15 }
 0x268   :  { %v1266_v26 = vsel %vm376_vm5, 1.0, %v2262_v1 }
 0x269   :  { %1911 = vmatpush3.bf16.msra.mxu0 %v1908_v23  ;;  %v604_v23 = vrot.slane %v2496_v8, 1  ;;  %v610_v8 = vsel %vm606_vm4, %v605_v28, %v602_v60 }
 0x26a   :  { %1913 = vmatprep.subr.bf16.mxu0 %v1912_v27  ;;  %v614_v34 = vmul.f32 %v1267_v31, %v610_v8  ;;  %v935_v31 = vld [vmem:[#allocation10 + $0x28] sm:$0xff] }
 0x26d   :  { %1915 = vmatpush3.bf16.msra.mxu0 %v1912_v27  ;;  %v608_v27 = vsel %vm606_vm4, %v603_v61, %v604_v23  ;;  %v930_v61 = vld [vmem:[#allocation10] sm:$0xff] }
 0x26e   :  { %1917 = vmatprep.subr.bf16.mxu0 %v1916_v32  ;;  %v612_v30 = vmul.f32 %v1266_v26, %v608_v27 }
 0x271   :  { %1919 = vmatpush3.bf16.msra.mxu0 %v1916_v32  ;;  %v607_v32 = vsel %vm606_vm4, %v604_v23, %v605_v28  ;;  %v932_v23 = vld [vmem:[#allocation10 + $0x10] sm:$0xff] }
 0x272   :  { %1921 = vmatprep.subr.bf16.mxu0 %v1920_v38  ;;  %v2008_v28 = vpack.c.bf16 %v933_v24, %v932_v23 }
 0x275   :  { %1923 = vmatpush3.bf16.msra.mxu0 %v1920_v38 }
 0x276   :  { %1925 = vmatprep.subr.bf16.mxu0 %v1924_v44 }
 0x278   :  { %1591 = vmatmul.mubr.f32.vlgmr.msra.gmra.mrb[2].mxu0 %v394_v56 }
 0x279   :  { %1593 = vmatprep.mubr.f32.mxu0 %v398_v57  ;;  %1927 = vmatpush3.bf16.msra.mxu0 %v1924_v44 }
 0x27a   :  { %1929 = vmatprep.subr.bf16.mxu0 %v1928_v51 }
 0x27c   :  { %1594 = vmatmul.mubr.f32.gmra.mrb[4].mxu0 %v392_v63 }
 0x27d   :  { %1931 = vmatpush3.bf16.msra.mxu0 %v1928_v51  ;;  %1628 = vmatprep.mubr.f32.mxu0 %v609_v4 }
 0x27e   :  { %1933 = vmatprep.subr.bf16.mxu0 %v1932_v62 }
 0x281   :  { %1935 = vmatpush3.bf16.msra.mxu0 %v1932_v62  ;;  %v931_v62 = vld [vmem:[#allocation10 + $0x8] sm:$0xff] }
 0x282   :  { %1937 = vmatprep.subr.bf16.mxu0 %v1936_v52  ;;  %v2004_v63 = vpack.c.bf16 %v931_v62, %v930_v61 }
 0x285   :  { %1939 = vmatpush3.bf16.msra.mxu0 %v1936_v52 }
 0x286   :  { %1941 = vmatprep.subr.bf16.mxu0 %v1940_v6 }
 0x289   :  { %1943 = vmatpush3.bf16.msra.mxu0 %v1940_v6 }
 0x28a   :  { %1945 = vmatprep.subr.bf16.mxu0 %v1944_v9 }
 0x28d   :  { %1947 = vmatpush3.bf16.msra.mxu0 %v1944_v9 }
 0x28e   :  { %1949 = vmatprep.subr.bf16.mxu0 %v1948_v16 }
 0x291   :  { %1951 = vmatpush3.bf16.msra.mxu0 %v1948_v16 }
 0x292   :  { %1953 = vmatprep.subr.bf16.mxu0 %v1952_v22 }
 0x295   :  { %1955 = vmatpush3.bf16.msra.mxu0 %v1952_v22 }
 0x296   :  { %2036 = vmatprep.subr.bf16.mxu0 %v2260_v0 }
 0x298   :  { %1629 = vmatmul.mubr.f32.vlgmr.msra.gmra.mrb[2].mxu0 %v612_v30  ;;  %v934_v30 = vld [vmem:[#allocation10 + $0x20] sm:$0xff] }
 0x299   :  { %1631 = vmatprep.mubr.f32.mxu0 %v607_v32  ;;  %2038 = vmatpush3.bf16.msra.mxu0 %v2372_v5  ;;  %v2012_v8 = vpack.c.bf16 %v935_v31, %v934_v30  ;;  %v936_v32 = vld [vmem:[#allocation10 + $0x30] sm:$0xff] }
 0x29a   :  { %2039 = vmatprep.subr.bf16.mxu0 %v2260_v0 }
 0x29c   :  { %1632 = vmatmul.mubr.f32.gmra.mrb[4].mxu0 %v614_v34  ;;  %v937_v34 = vld [vmem:[#allocation10 + $0x38] sm:$0xff] }
 0x29d   :  { %2041 = vmatpush3.bf16.msra.mxu0 %v2375_v7  ;;  %1774 = vmatprep.mubr.msk.f32.mxu0 %vm2261_vm0, %v2262_v1  ;;  %v2016_v54 = vpack.c.bf16 %v937_v34, %v936_v32 }
 0x29e   :  { %2042 = vmatprep.subr.bf16.mxu0 %v2260_v0 }
 0x2a1   :  { %2044 = vmatpush3.bf16.msra.mxu0 %v2389_v14 }
 0x2a2   :  { %2045 = vmatprep.subr.bf16.mxu0 %v2260_v0 }
 0x2a5   :  { %2047 = vmatpush3.bf16.msra.mxu0 %v2399_v20 }
 0x2a6   :  { %2048 = vmatprep.subr.bf16.mxu0 %v2260_v0 }
 0x2a9   :  { %2050 = vmatpush3.bf16.msra.mxu0 %v2405_v25 }
 0x2aa   :  { %2051 = vmatprep.subr.bf16.mxu0 %v2260_v0 }
 0x2ad   :  { %2053 = vmatpush3.bf16.msra.mxu0 %v2411_v29 }
 0x2ae   :  { %2054 = vmatprep.subr.bf16.mxu0 %v2260_v0 }
 0x2b1   :  { %2056 = vmatpush3.bf16.msra.mxu0 %v2417_v33 }
 0x2b2   :  { %2057 = vmatprep.subr.bf16.mxu0 %v2260_v0 }
 0x2b5   :  { %2059 = vmatpush3.bf16.msra.mxu0 %v2423_v37 }
 0x36b   :  { %v1630_v36 = vpop.f32.mrb[2].mxu0 }
 0x36c   :  { %v697_v38 = vpop.f32.mrb[3].mxu0  ;;  %v725_v39 = vadd.f32 %v1630_v36, %v723_v35  ;;  %v939_v36 = vld [vmem:[#allocation10 + $0x48] sm:$0xff] }
 0x36d   :  { %v724_v41 = vadd.f32 %v723_v35, %v697_v38 }
 0x36f   :  { %v1633_v42 = vpop.f32.mrb[4].mxu0  ;;  %v728_v44 = vadd.f32 %v725_v39, %v724_v41 }
 0x370   :  { %v707_v43 = vpop.f32.mrb[5].mxu0  ;;  %v727_v48 = vadd.f32 %v1633_v42, %v723_v35 }
 0x371   :  { %v726_v45 = vadd.f32 %v723_v35, %v707_v43  ;;  %v938_v35 = vld [vmem:[#allocation10 + $0x40] sm:$0xff] }
 0x372   :  { %v2020_v38 = vpack.c.bf16 %v939_v36, %v938_v35  ;;  %v942_v43 = vld [vmem:[#allocation10 + $0x60] sm:$0xff] }
 0x373   :  { %v729_v49 = vadd.f32 %v728_v44, %v726_v45  ;;  %v943_v44 = vld [vmem:[#allocation10 + $0x68] sm:$0xff] }
 0x375   :  { %v730_v50 = vadd.f32 %v729_v49, %v727_v48  ;;  %v945_v49 = vld [vmem:[#allocation10 + $0x78] sm:$0xff] }
 0x377   :  { %v731_v51 = vrot.slane %v730_v50, 4 }
 0x379   :  { %v732_v56 = vadd.f32 %v731_v51, %v730_v50 }
 0x37b   :  { %v733_v57 = vrot.slane %v732_v56, 2 }
 0x37d   :  { %v734_v58 = vadd.f32 %v733_v57, %v732_v56 }
 0x37f   :  { %v735_v59 = vrot.slane %v734_v58, 1 }
 0x381   :  { %v736_v60 = vadd.f32 %v735_v59, %v734_v58  ;;  %v912_v59 = vsub.s32 3, %v2431_v46 }
 0x383   :  { %1667 = vmatmul.mubr.f32.vlgmr.msra.gmra.mrb[2].mxu1 %v736_v60  ;;  %v920_v60 = vsub.s32 4, %v2431_v46 }
 0x384   :  { %1982 = vmatpush3.bf16.msra.mxu1 %v2372_v5  ;;  %1701 = vmatprep.mubr.msk.f32.mxu1 %vm2261_vm0, %v2262_v1 }
 0x385   :  { %1983 = vmatprep.subr.bf16.mxu1 %v2260_v0 }
 0x388   :  { %1985 = vmatpush3.bf16.msra.mxu1 %v2375_v7 }
 0x389   :  { %1986 = vmatprep.subr.bf16.mxu1 %v2260_v0 }
 0x38c   :  { %1988 = vmatpush3.bf16.msra.mxu1 %v2389_v14 }
 0x38d   :  { %1989 = vmatprep.subr.bf16.mxu1 %v2260_v0 }
 0x390   :  { %1991 = vmatpush3.bf16.msra.mxu1 %v2399_v20 }
 0x391   :  { %1992 = vmatprep.subr.bf16.mxu1 %v2260_v0 }
 0x394   :  { %1994 = vmatpush3.bf16.msra.mxu1 %v2405_v25 }
 0x395   :  { %1995 = vmatprep.subr.bf16.mxu1 %v2260_v0 }
 0x398   :  { %1997 = vmatpush3.bf16.msra.mxu1 %v2411_v29 }
 0x399   :  { %1998 = vmatprep.subr.bf16.mxu1 %v2260_v0 }
 0x39c   :  { %2000 = vmatpush3.bf16.msra.mxu1 %v2417_v33 }
 0x39d   :  { %2001 = vmatprep.subr.bf16.mxu1 %v2260_v0 }
 0x3a0   :  { %2003 = vmatpush3.bf16.msra.mxu1 %v2423_v37 }
 0x3a1   :  { %2005 = vmatprep.subr.bf16.mxu1 %v2004_v63 }
 0x456   :  { %v803_v2 = vpop.f32.mrb[2].mxu1 }
 0x457   :  { %v807_v3 = vmul.f32 0.001953125, %v803_v2  ;;  %v1668_v4 = vpop.f32.mrb[3].mxu1  ;;  %v921_v2 = vrot.slane %v2475_v40, %v920_v60 }
 0x459   :  { %v811_v52 = vrot.slane %v807_v3, %v2434_v47 }
 0x45b   :  { %v2574_v53 = vsub.f32 %v724_v41, %v811_v52  ;;  %v2576_v55 = vsub.f32 %v725_v39, %v811_v52  ;;  %v2578_v6 = vsub.f32 %v726_v45, %v811_v52  ;;  %v2580_v10 = vsub.f32 %v727_v48, %v811_v52  ;;  %v940_v39 = vld [vmem:[#allocation10 + $0x50] sm:$0xff]  ;;  %v941_v41 = vld [vmem:[#allocation10 + $0x58] sm:$0xff] }
 0x45c   :  { %v2024_v42 = vpack.c.bf16 %v941_v41, %v940_v39  ;;  %v944_v45 = vld [vmem:[#allocation10 + $0x70] sm:$0xff]  ;;  %v2028_v48 = vpack.c.bf16 %v943_v44, %v942_v43 }
 0x45d   :  { %v816_v11 = vmul.f32 %v2574_v53, %v2574_v53  ;;  %v817_v9 = vmul.f32 %v2576_v55, %v2576_v55  ;;  %v818_v12 = vmul.f32 %v2578_v6, %v2578_v6  ;;  %v819_v15 = vmul.f32 %v2580_v10, %v2580_v10 }
 0x45e   :  { %v2032_v50 = vpack.c.bf16 %v945_v49, %v944_v45 }
 0x45f   :  { %v820_v13 = vadd.f32 %v817_v9, %v816_v11 }
 0x461   :  { %v821_v16 = vadd.f32 %v820_v13, %v818_v12 }
 0x463   :  { %v822_v17 = vadd.f32 %v821_v16, %v819_v15 }
 0x465   :  { %v823_v18 = vrot.slane %v822_v17, 4 }
 0x467   :  { %v824_v19 = vadd.f32 %v823_v18, %v822_v17 }
 0x469   :  { %v825_v21 = vrot.slane %v824_v19, 2 }
 0x46b   :  { %v826_v22 = vadd.f32 %v825_v21, %v824_v19 }
 0x46d   :  { %v827_v26 = vrot.slane %v826_v22, 1 }
 0x46f   :  { %v828_v27 = vadd.f32 %v827_v26, %v826_v22 }
 0x471   :  { %1702 = vmatmul.mubr.f32.vlgmr.msra.gmra.mrb[4].mxu1 %v828_v27 }
 0x472   :  { %2007 = vmatpush3.bf16.msra.mxu1 %v2004_v63  ;;  %v913_v63 = vrot.slane %v2475_v40, %v912_v59 }
 0x473   :  { %2009 = vmatprep.subr.bf16.mxu1 %v2008_v28 }
 0x476   :  { %2011 = vmatpush3.bf16.msra.mxu1 %v2008_v28 }
 0x477   :  { %2013 = vmatprep.subr.bf16.mxu1 %v2012_v8 }
 0x47a   :  { %2015 = vmatpush3.bf16.msra.mxu1 %v2012_v8 }
 0x47b   :  { %2017 = vmatprep.subr.bf16.mxu1 %v2016_v54 }
 0x47e   :  { %2019 = vmatpush3.bf16.msra.mxu1 %v2016_v54 }
 0x47f   :  { %2021 = vmatprep.subr.bf16.mxu1 %v2020_v38 }
 0x482   :  { %2023 = vmatpush3.bf16.msra.mxu1 %v2020_v38 }
 0x483   :  { %2025 = vmatprep.subr.bf16.mxu1 %v2024_v42 }
 0x486   :  { %2027 = vmatpush3.bf16.msra.mxu1 %v2024_v42 }
 0x487   :  { %2029 = vmatprep.subr.bf16.mxu1 %v2028_v48 }
 0x48a   :  { %2031 = vmatpush3.bf16.msra.mxu1 %v2028_v48 }
 0x48b   :  { %2033 = vmatprep.subr.bf16.mxu1 %v2032_v50 }
 0x48e   :  { %2035 = vmatpush3.bf16.msra.mxu1 %v2032_v50 }
 0x48f   :  { %2060 = vmatprep.subr.bf16.mxu1 %v2260_v0 }
 0x544   :  { %v895_v51 = vpop.f32.mrb[4].mxu1 }
 0x545   :  { %v899_v56 = vmul.f32 0.001953125, %v895_v51  ;;  %v1703_v57 = vpop.f32.mrb[5].mxu1 }
 0x547   :  { %v900_v58 = vadd.f32 1e-05, %v899_v56 }
 0x549   :  { %2105 = vrsqrt.f32 %v900_v58 }
 0x553   :  { %v2106_v61 = vpop.eup %2105 }
 0x554   :  { %v905_v62 = vrot.slane %v2106_v61, %v2434_v47 }
 0x556   :  { %v906_v3 = vmul.f32 %v905_v62, %v2574_v53  ;;  %v907_v4 = vmul.f32 %v905_v62, %v2576_v55  ;;  %v908_v52 = vmul.f32 %v905_v62, %v2578_v6  ;;  %v909_v11 = vmul.f32 %v905_v62, %v2580_v10 }
 0x558   :  { %v914_v9 = vmul.f32 %v913_v63, %v906_v3  ;;  %v915_v12 = vmul.f32 %v913_v63, %v907_v4  ;;  %v916_v13 = vmul.f32 %v913_v63, %v908_v52  ;;  %v917_v15 = vmul.f32 %v913_v63, %v909_v11 }
 0x559   :  { %v1227_v3 = vsub.s32 7, %v2431_v46 }
 0x55a   :  { %v922_v16 = vadd.f32 %v921_v2, %v914_v9  ;;  %v923_v17 = vadd.f32 %v921_v2, %v915_v12  ;;  %v924_v18 = vadd.f32 %v921_v2, %v916_v13  ;;  %v925_v22 = vadd.f32 %v921_v2, %v917_v15 }
 0x55b   :  { %v1219_v2 = vsub.s32 6, %v2431_v46  ;;  %v1228_v9 = vrot.slane %v2475_v40, %v1227_v3 }
 0x55c   :  { %v926_v19 = vmax.f32 %v922_v16, 0.0  ;;  %v927_v21 = vmax.f32 %v923_v17, 0.0  ;;  %v928_v23 = vmax.f32 %v924_v18, 0.0  ;;  %v929_v53 = vmax.f32 %v925_v22, 0.0 }
 0x55d   :  { %v1220_v11 = vrot.slane %v2475_v40, %v1219_v2 }
 0x55e   :  { %1736 = vmatprep.mubr.f32.mxu1 %v926_v19 }
 0x55f   :  { %1737 = vmatmul.mubr.f32.vlgmr.msra.gmra.mrb[6].mxu1 %v927_v21 }
 0x560   :  { %1739 = vmatprep.mubr.f32.mxu1 %v928_v23  ;;  %2062 = vmatpush3.bf16.msra.mxu1 %v2372_v5 }
 0x561   :  { %2063 = vmatprep.subr.bf16.mxu1 %v2260_v0 }
 0x563   :  { %1740 = vmatmul.mubr.f32.gmra.mrb[8].mxu1 %v929_v53 }
 0x564   :  { %2065 = vmatpush3.bf16.msra.mxu1 %v2375_v7  ;;  %1809 = vmatprep.mubr.msk.f32.mxu1 %vm2261_vm0, %v2262_v1  ;;  %v948_v1 = vsub.s32 5, %v2431_v46  ;;  %v2109_v46 = vld [vmem:[#allocation2] sm:$0xff] }
 0x565   :  { %2066 = vmatprep.subr.bf16.mxu1 %v2260_v0 }
 0x566   :  { %v949_v5 = vrot.slane %v2475_v40, %v948_v1 }
 0x568   :  { %2068 = vmatpush3.bf16.msra.mxu1 %v2389_v14 }
 0x569   :  { %2069 = vmatprep.subr.bf16.mxu1 %v2260_v0 }
 0x56c   :  { %2071 = vmatpush3.bf16.msra.mxu1 %v2399_v20 }
 0x56d   :  { %2072 = vmatprep.subr.bf16.mxu1 %v2260_v0 }
 0x570   :  { %2074 = vmatpush3.bf16.msra.mxu1 %v2405_v25 }
 0x571   :  { %2075 = vmatprep.subr.bf16.mxu1 %v2260_v0 }
 0x574   :  { %2077 = vmatpush3.bf16.msra.mxu1 %v2411_v29 }
 0x575   :  { %2078 = vmatprep.subr.bf16.mxu1 %v2260_v0 }
 0x578   :  { %2080 = vmatpush3.bf16.msra.mxu1 %v2417_v33 }
 0x579   :  { %2081 = vmatprep.subr.bf16.mxu1 %v2260_v0 }
 0x57c   :  { %2083 = vmatpush3.bf16.msra.mxu1 %v2423_v37 }
 0x632   :  { %v1738_v7 = vpop.f32.mrb[6].mxu1 }
 0x633   :  { %v1016_v14 = vpop.f32.mrb[7].mxu1  ;;  %v1022_v20 = vadd.f32 %v1738_v7, %v949_v5 }
 0x634   :  { %v1017_v25 = vadd.f32 %v1016_v14, %v949_v5  ;;  %v2111_v14 = vld [vmem:[#allocation2 + $0x10] sm:$0xff] }
 0x636   :  { %v1741_v55 = vpop.f32.mrb[8].mxu1  ;;  %v1035_v10 = vadd.f32 %v1022_v20, %v1017_v25 }
 0x637   :  { %v1026_v6 = vpop.f32.mrb[9].mxu1  ;;  %v1032_v24 = vadd.f32 %v1741_v55, %v949_v5 }
 0x638   :  { %v1027_v29 = vadd.f32 %v1026_v6, %v949_v5  ;;  %v2110_v5 = vld [vmem:[#allocation2 + $0x8] sm:$0xff] }
 0x63a   :  { %v1036_v26 = vadd.f32 %v1035_v10, %v1027_v29 }
 0x63c   :  { %v1037_v27 = vadd.f32 %v1036_v26, %v1032_v24 }
 0x63e   :  { %v1038_v33 = vrot.slane %v1037_v27, 4 }
 0x640   :  { %v1039_v28 = vadd.f32 %v1038_v33, %v1037_v27 }
 0x642   :  { %v1040_v0 = vrot.slane %v1039_v28, 2 }
 0x644   :  { %v1041_v30 = vadd.f32 %v1040_v0, %v1039_v28 }
 0x646   :  { %v1042_v37 = vrot.slane %v1041_v30, 1 }
 0x648   :  { %v1043_v31 = vadd.f32 %v1042_v37, %v1041_v30 }
 0x64a   :  { %1775 = vmatmul.mubr.f32.vlgmr.msra.gmra.mrb[6].mxu0 %v1043_v31 }
 0x71d   :  { %v1110_v8 = vpop.f32.mrb[6].mxu0 }
 0x71e   :  { %v1114_v32 = vmul.f32 0.001953125, %v1110_v8  ;;  %v1776_v34 = vpop.f32.mrb[7].mxu0 }
 0x720   :  { %v1118_v54 = vrot.slane %v1114_v32, %v2434_v47 }
 0x722   :  { %v1119_v35 = vsub.f32 %v1017_v25, %v1118_v54  ;;  %v1120_v36 = vsub.f32 %v1022_v20, %v1118_v54  ;;  %v1121_v38 = vsub.f32 %v1027_v29, %v1118_v54  ;;  %v1122_v39 = vsub.f32 %v1032_v24, %v1118_v54  ;;  %v2112_v20 = vld [vmem:[#allocation2 + $0x18] sm:$0xff] }
 0x724   :  { %v1123_v41 = vmul.f32 %v1119_v35, %v1119_v35  ;;  %v1124_v42 = vmul.f32 %v1120_v36, %v1120_v36  ;;  %v1125_v43 = vmul.f32 %v1121_v38, %v1121_v38  ;;  %v1126_v45 = vmul.f32 %v1122_v39, %v1122_v39 }
 0x726   :  { %v1127_v44 = vadd.f32 %v1124_v42, %v1123_v41 }
 0x728   :  { %v1128_v48 = vadd.f32 %v1127_v44, %v1125_v43 }
 0x72a   :  { %v1129_v49 = vadd.f32 %v1128_v48, %v1126_v45 }
 0x72c   :  { %v1130_v50 = vrot.slane %v1129_v49, 4 }
 0x72e   :  { %v1131_v51 = vadd.f32 %v1130_v50, %v1129_v49 }
 0x730   :  { %v1132_v56 = vrot.slane %v1131_v51, 2 }
 0x732   :  { %v1133_v57 = vadd.f32 %v1132_v56, %v1131_v51 }
 0x734   :  { %v1134_v58 = vrot.slane %v1133_v57, 1 }
 0x736   :  { %v1135_v59 = vadd.f32 %v1134_v58, %v1133_v57 }
 0x738   :  { %1810 = vmatmul.mubr.f32.vlgmr.msra.gmra.mrb[10].mxu1 %v1135_v59 }
 0x80b   :  { %v1202_v60 = vpop.f32.mrb[10].mxu1 }
 0x80c   :  { %v1206_v61 = vmul.f32 0.001953125, %v1202_v60  ;;  %v1811_v62 = vpop.f32.mrb[11].mxu1 }
 0x80e   :  { %v1207_v63 = vadd.f32 1e-05, %v1206_v61 }
 0x810   :  { %2107 = vrsqrt.f32 %v1207_v63 }
 0x81a   :  { %v2108_v4 = vpop.eup %2107 }
 0x81b   :  { %v1212_v52 = vrot.slane %v2108_v4, %v2434_v47 }
 0x81d   :  { %v1213_v12 = vmul.f32 %v1212_v52, %v1119_v35  ;;  %v1214_v13 = vmul.f32 %v1212_v52, %v1120_v36  ;;  %v1215_v15 = vmul.f32 %v1212_v52, %v1121_v38  ;;  %v1216_v16 = vmul.f32 %v1212_v52, %v1122_v39 }
 0x81f   :  { %v1221_v17 = vmul.f32 %v1220_v11, %v1213_v12  ;;  %v1222_v18 = vmul.f32 %v1220_v11, %v1214_v13  ;;  %v1223_v19 = vmul.f32 %v1220_v11, %v1215_v15  ;;  %v1224_v21 = vmul.f32 %v1220_v11, %v1216_v16 }
 0x821   :  { %v1229_v22 = vadd.f32 %v1228_v9, %v1221_v17  ;;  %v1230_v23 = vadd.f32 %v1228_v9, %v1222_v18  ;;  %v1231_v53 = vadd.f32 %v1228_v9, %v1223_v19  ;;  %v1232_v1 = vadd.f32 %v1228_v9, %v1224_v21 }
 0x823   :  { %v1233_v47 = vadd.f32 %v2109_v46, %v1229_v22  ;;  %v1234_v7 = vadd.f32 %v2110_v5, %v1230_v23  ;;  %v1235_v40 = vadd.f32 %v2111_v14, %v1231_v53  ;;  %v1236_v25 = vadd.f32 %v2112_v20, %v1232_v1 }
 0x825   :  { %v1237_v55 = vmax.f32 %v1233_v47, 0.0  ;;  %v1238_v6 = vmax.f32 %v1234_v7, 0.0  ;;  %v1239_v10 = vmax.f32 %v1235_v40, 0.0  ;;  %v1240_v29 = vmax.f32 %v1236_v25, 0.0 }
 0x827   :  { %1241 = vst [vmem:[#allocation11] sm:$0xff] %v1237_v55  ;;  %1242 = vst [vmem:[#allocation11 + $0x8] sm:$0xff] %v1238_v6 }
 0x828   :  { %1243 = vst [vmem:[#allocation11 + $0x10] sm:$0xff] %v1239_v10  ;;  %1244 = vst [vmem:[#allocation11 + $0x18] sm:$0xff] %v1240_v29 }
 0x829   :  { %2234 = shalt.err (!%p2231_p2)
}
 0x82a   :  { %s2235_s30 = scalar_lea.hbm %s2645_s5, 512 }
 0x82b   :  { %p2236_p3 = scmp.ne.s32.totalorder %s2645_s5, %s2235_s30  ;;  %p2239_p4 = scmp.lt.u32.totalorder %s2235_s30, %s2645_s5 }
 0x82d   :  { %p2241_p5 = pnand %p2239_p4, %p2236_p3 }
 0x82f   :  { %2244 = shalt.err (!%p2241_p5)
}
 0x830   :  { %1256 = dma.vmem_to_hbm [thread:$0]  %s1251_s27, 512, %s2645_s5, [#allocation4], %s2256_s16, %s2256_s16, %s2257_s17  }
 0x831   :  { %2251 = dma.done.wait [#allocation4], 512  }
 0x832   :  { %2252 = vsyncadd [#allocation4], 4294966784 }
 0x833   :  { %1260 = vsyncpa [#allocation3], 1 }
 0x834   :  { %1261 = vsyncpa [#allocation6], 1 }
 0x835   :  { %1262 = vsyncpa [#allocation9], 1 }
 0x836   :  { %1263 = vsyncpa [#allocation4], 1 }

</bundles_post_ra>
